<compile_context>
chip_gen: v7x
topology: tpu7x:2x2x1
jax: 0.10.0
libtpu: 0.0.40
codegen_flags: <defaults>
</compile_context>

<pallas_src>
import jax
import jax.numpy as jnp
from jax import lax
from jax.experimental import pallas as pl
from jax.experimental.pallas import tpu as pltpu

MIN_DURATION = 1.0
MAX_DURATION = 75.0

_SMALL_INPUT_BYTES = 256 * 1024          # below this, plain-JAX fallback wins
_TARGET_X_TILE_BYTES = 4 * 1024 * 1024   # 2-8 MiB/step reaches >85% of HBM roofline
_WORKING_SET_BUDGET = 32 * 1024 * 1024   # per-step VMEM budget (safe on all gens)
_MAX_TM_ROWS = 16384


def duration_predictor_kernel(x_ref, w1_ref, b1_ref, w2_ref, b2_ref,
                              w3_ref, b3_ref, o_ref):
    # x tile in its native dtype; f32 accumulation on the MXU.
    x = x_ref[...]                                                   # (tm, E)

    # fc1 + relu
    h1 = jnp.maximum(
        jnp.dot(x, w1_ref[...], preferred_element_type=jnp.float32)
        + b1_ref[...], 0.0)                                          # (tm, h1) f32

    # fc2 + relu
    h2 = jnp.maximum(
        jnp.dot(h1, w2_ref[...], preferred_element_type=jnp.float32)
        + b2_ref[...], 0.0)                                          # (tm, h2) f32

    # fc3 + sigmoid as an explicit contraction of the last dims of
    # (1, h2) x (tm, h2) -> lane-dense (1, tm) row (MXU transpose flags,
    # no column store).
    z = lax.dot_general(w3_ref[...], h2,
                        dimension_numbers=(((1,), (1,)), ((), ())),
                        preferred_element_type=jnp.float32) + b3_ref[...]
    y = jax.nn.sigmoid(z)                                            # (1, tm)

    dur = MIN_DURATION + y * (MAX_DURATION - MIN_DURATION)
    o_ref[0] = dur.astype(o_ref.dtype)                               # (1, tm) slice


def _tensorcores_per_chip():
    """Best-effort detection of multi-TensorCore chips (v7x); defaults to 1."""
    try:
        kind = jax.devices()[0].device_kind.lower()
    except Exception:
        return 1
    return 2 if "v7" in kind else 1


def _choose_tm(n_rows, e_dim, itemsize, h1, h2, min_steps):
    """Row-tile size: ~4 MiB of x per step, working set under the VMEM budget,
    and (only on multi-TC chips) at least `min_steps` grid steps."""
    row_bytes = max(1, e_dim * itemsize)
    tm = _TARGET_X_TILE_BYTES // row_bytes
    # 2x double-buffered x tile + loaded x value + f32 intermediates per row.
    per_row_bytes = 3 * row_bytes + 4 * (h1 + h2)
    tm = min(tm, _WORKING_SET_BUDGET // per_row_bytes)
    tm = min(tm, _MAX_TM_ROWS)
    tm = max(tm, 8)
    if min_steps > 1:
        tm = min(tm, max(8, -(-n_rows // min_steps)))
    if tm >= n_rows:
        return n_rows                     # single full-extent block
    if tm >= 128:
        tm -= tm % 128                    # lane-dense output rows
    else:
        tm -= tm % 8                      # sublane-aligned
    return max(tm, 8)


def _vmem_limit_bytes(tm, e_dim, itemsize, h1, h2, weight_bytes, out_itemsize):
    x_tile = tm * e_dim * itemsize
    est = (2 * x_tile                      # double-buffered x input
           + x_tile                        # loaded x value
           + 4 * tm * (h1 + h2)            # f32 intermediates
           + 2 * weight_bytes              # double-buffered resident weights
           + 2 * tm * out_itemsize         # output tile buffers
           + 2 * 1024 * 1024)              # compiler-temp slack
    # Generous headroom, capped so it stays inside v7x's 64 MiB physical VMEM.
    return int(min(max(2 * est, 16 * 1024 * 1024), 48 * 1024 * 1024))


def _jnp_forward(x, params):
    """Plain-JAX forward (also used as the reference)."""
    w1, b1, w2, b2, w3, b3 = params
    h1 = jax.nn.relu(x @ w1 + b1)
    h2 = jax.nn.relu(h1 @ w2 + b2)
    y = jax.nn.sigmoid(h2 @ w3 + b3)
    return MIN_DURATION + y * (MAX_DURATION - MIN_DURATION)


def duration_predictor(x, params, *, tm=None, use_kernel=None):
    """x: (..., embedding_dim) -> duration: (..., 1)"""
    w1, b1, w2, b2, w3, b3 = params
    orig_shape = x.shape
    E = orig_shape[-1]
    x2d = x.reshape(-1, E)
    n = x2d.shape[0]

    itemsize = jnp.dtype(x2d.dtype).itemsize
    out_itemsize = itemsize

    if use_kernel is None:
        # Tiny inputs: a fused 3-layer MLP in XLA beats the pallas_call prologue.
        use_kernel = n * E * itemsize >= _SMALL_INPUT_BYTES
    if not use_kernel:
        return _jnp_forward(x, params)

    h1 = w1.shape[1]
    h2 = w2.shape[1]

    cores = _tensorcores_per_chip()
    min_steps = 2 * cores if cores > 1 else 1

    if tm is None:
        tm = _choose_tm(n, E, itemsize, h1, h2, min_steps)
    tm = max(1, min(tm, n))
    num_tiles = pl.cdiv(n, tm)

    # Present fc3 weight as a (1, h2) row (same values as the (h2, 1) column).
    w3_row = w3.reshape(1, -1)
    b3_2d = b3.reshape(1, 1)

    weight_bytes = sum(int(a.size) * jnp.dtype(a.dtype).itemsize
                       for a in (w1, b1, w2, b2, w3, b3))
    vmem_limit = _vmem_limit_bytes(tm, E, itemsize, h1, h2,
                                   weight_bytes, out_itemsize)

    flops = 2 * n * (E * h1 + h1 * h2 + h2)
    bytes_accessed = n * E * itemsize + n * out_itemsize + weight_bytes

    out = pl.pallas_call(
        duration_predictor_kernel,
        out_shape=jax.ShapeDtypeStruct((num_tiles, 1, tm), x.dtype),
        grid_spec=pltpu.PrefetchScalarGridSpec(
            num_scalar_prefetch=0,
            grid=(num_tiles,),
            in_specs=[
                pl.BlockSpec((tm, E), lambda i: (i, 0)),      # x row tile (pipelined)
                pl.BlockSpec((E, h1), lambda i: (0, 0)),      # W1 (grid-invariant)
                pl.BlockSpec((1, h1), lambda i: (0, 0)),      # b1
                pl.BlockSpec((h1, h2), lambda i: (0, 0)),     # W2
                pl.BlockSpec((1, h2), lambda i: (0, 0)),      # b2
                pl.BlockSpec((1, h2), lambda i: (0, 0)),      # W3 as a row
                pl.BlockSpec((1, 1), lambda i: (0, 0)),       # b3
            ],
            # Lane-dense output: one (1, 1, tm) duration row per grid step.
            out_specs=pl.BlockSpec((1, 1, tm), lambda i: (i, 0, 0)),
        ),
        compiler_params=pltpu.CompilerParams(
            dimension_semantics=("parallel",),
            vmem_limit_bytes=vmem_limit),
        cost_estimate=pl.CostEstimate(
            flops=int(flops),
            transcendentals=int(n),
            bytes_accessed=int(bytes_accessed)),
    )(x2d, w1, b1, w2, b2, w3_row, b3_2d)

    # Flatten lane-dense tiles back to per-row order; drop tail rows coming
    # from the masked partial last block.
    return out.reshape(-1)[:n].reshape(orig_shape[:-1] + (1,))


def init_params(key, embedding_dim, hidden_dim=128, dtype=jnp.float32):
    """Deterministic init matching nn.Linear shapes (stored transposed: (in, out))."""
    h1, h2 = hidden_dim // 4, hidden_dim // 8
    ks = jax.random.split(key, 6)

    def linear(kw, kb, fan_in, fan_out):
        bound = 1.0 / jnp.sqrt(fan_in)
        w = jax.random.uniform(kw, (fan_in, fan_out), dtype, -bound, bound)
        b = jax.random.uniform(kb, (1, fan_out), dtype, -bound, bound)
        return w, b

    w1, b1 = linear(ks[0], ks[1], embedding_dim, h1)
    w2, b2 = linear(ks[2], ks[3], h1, h2)
    w3, b3 = linear(ks[4], ks[5], h2, 1)
    return (w1, b1, w2, b2, w3, b3)


if __name__ == "__main__":
    key = jax.random.PRNGKey(0)
    kx, kx2, kp = jax.random.split(key, 3)

    batch, seq, embedding_dim, hidden_dim = 2, 8, 32, 128
    params = init_params(kp, embedding_dim, hidden_dim)

    # Small shape, forced through the Pallas kernel (single full-extent tile).
    x = jax.random.normal(kx, (batch, seq, embedding_dim), jnp.float32)
    out = jax.block_until_ready(duration_predictor(x, params, use_kernel=True))
    ref = _jnp_forward(x, params)
    assert out.shape == (batch, seq, 1), out.shape
    assert jnp.allclose(out, ref, atol=1e-5, rtol=1e-5), (
        float(jnp.max(jnp.abs(out - ref))))

    # Multi-tile path: 300 rows with tm=128 -> 3 grid steps, masked partial tail.
    x2 = jax.random.normal(kx2, (3, 100, embedding_dim), jnp.float32)
    out2 = jax.block_until_ready(
        duration_predictor(x2, params, tm=128, use_kernel=True))
    ref2 = _jnp_forward(x2, params)
    assert out2.shape == (3, 100, 1), out2.shape
    assert jnp.allclose(out2, ref2, atol=1e-5, rtol=1e-5), (
        float(jnp.max(jnp.abs(out2 - ref2))))

    # Auto path for tiny inputs (plain-JAX fallback), smoke check.
    out3 = jax.block_until_ready(duration_predictor(x, params))
    assert jnp.allclose(out3, ref, atol=1e-6, rtol=1e-6)

    print("KERNEL_OK")
</pallas_src>

<mosaic_0001>
module attributes {stable_mosaic.version = 11 : i64} {
  func.func @duration_predictor_kernel(%arg0: i32, %arg1: memref<16x32xf32, #tpu.memory_space<vmem>>, %arg2: memref<32x32xf32, #tpu.memory_space<vmem>>, %arg3: memref<1x32xf32, #tpu.memory_space<vmem>>, %arg4: memref<32x16xf32, #tpu.memory_space<vmem>>, %arg5: memref<1x16xf32, #tpu.memory_space<vmem>>, %arg6: memref<1x16xf32, #tpu.memory_space<vmem>>, %arg7: memref<1x1xf32, #tpu.memory_space<vmem>>, %arg8: memref<1x1x16xf32, #tpu.memory_space<vmem>>) attributes {dimension_semantics = [#tpu.dimension_semantics<parallel>], iteration_bounds = array<i64: 1>, scalar_prefetch = 0 : i64, scratch_operands = 0 : i64, tpu.core_type = #tpu.core_type<tc>, window_params = [{transform_indices = @transform_0, window_bounds = array<i64: 16, 32>}, {pipeline_mode = #tpu.pipeline_mode<synchronous>, transform_indices = @transform_1, window_bounds = array<i64: 32, 32>}, {pipeline_mode = #tpu.pipeline_mode<synchronous>, transform_indices = @transform_2, window_bounds = array<i64: 1, 32>}, {pipeline_mode = #tpu.pipeline_mode<synchronous>, transform_indices = @transform_3, window_bounds = array<i64: 32, 16>}, {pipeline_mode = #tpu.pipeline_mode<synchronous>, transform_indices = @transform_4, window_bounds = array<i64: 1, 16>}, {pipeline_mode = #tpu.pipeline_mode<synchronous>, transform_indices = @transform_5, window_bounds = array<i64: 1, 16>}, {pipeline_mode = #tpu.pipeline_mode<synchronous>, transform_indices = @transform_6, window_bounds = array<i64: 1, 1>}, {transform_indices = @transform_7, window_bounds = array<i64: 1, 1, 16>}]} {
    %c0 = arith.constant 0 : index
    %c0_0 = arith.constant 0 : index
    %0 = vector.load %arg1[%c0, %c0_0] : memref<16x32xf32, #tpu.memory_space<vmem>>, vector<16x32xf32>
    %c0_1 = arith.constant 0 : index
    %c0_2 = arith.constant 0 : index
    %1 = vector.load %arg2[%c0_1, %c0_2] : memref<32x32xf32, #tpu.memory_space<vmem>>, vector<32x32xf32>
    %cst = arith.constant dense<0.000000e+00> : vector<16x32xf32>
    %2 = tpu.matmul %0, %1, %cst {dimension_numbers = #tpu.dot_dimension_numbers<[1], [0], [0], [1], [0, 0, 1, 1], [], []>} : vector<16x32xf32>, vector<32x32xf32>, vector<16x32xf32> -> vector<16x32xf32>
    %c0_3 = arith.constant 0 : index
    %c0_4 = arith.constant 0 : index
    %3 = vector.load %arg3[%c0_3, %c0_4] : memref<1x32xf32, #tpu.memory_space<vmem>>, vector<1x32xf32>
    %4 = vector.broadcast %3 : vector<1x32xf32> to vector<16x32xf32>
    %5 = arith.addf %2, %4 : vector<16x32xf32>
    %cst_5 = arith.constant 0.000000e+00 : f32
    %6 = vector.broadcast %cst_5 : f32 to vector<16x32xf32>
    %7 = arith.maximumf %5, %6 : vector<16x32xf32>
    %c0_6 = arith.constant 0 : index
    %c0_7 = arith.constant 0 : index
    %8 = vector.load %arg4[%c0_6, %c0_7] : memref<32x16xf32, #tpu.memory_space<vmem>>, vector<32x16xf32>
    %cst_8 = arith.constant dense<0.000000e+00> : vector<16x16xf32>
    %9 = tpu.matmul %7, %8, %cst_8 {dimension_numbers = #tpu.dot_dimension_numbers<[1], [0], [0], [1], [0, 0, 1, 1], [], []>} : vector<16x32xf32>, vector<32x16xf32>, vector<16x16xf32> -> vector<16x16xf32>
    %c0_9 = arith.constant 0 : index
    %c0_10 = arith.constant 0 : index
    %10 = vector.load %arg5[%c0_9, %c0_10] : memref<1x16xf32, #tpu.memory_space<vmem>>, vector<1x16xf32>
    %11 = vector.broadcast %10 : vector<1x16xf32> to vector<16x16xf32>
    %12 = arith.addf %9, %11 : vector<16x16xf32>
    %cst_11 = arith.constant 0.000000e+00 : f32
    %13 = vector.broadcast %cst_11 : f32 to vector<16x16xf32>
    %14 = arith.maximumf %12, %13 : vector<16x16xf32>
    %c0_12 = arith.constant 0 : index
    %c0_13 = arith.constant 0 : index
    %15 = vector.load %arg6[%c0_12, %c0_13] : memref<1x16xf32, #tpu.memory_space<vmem>>, vector<1x16xf32>
    %cst_14 = arith.constant dense<0.000000e+00> : vector<1x16xf32>
    %16 = tpu.matmul %15, %14, %cst_14 {dimension_numbers = #tpu.dot_dimension_numbers<[1], [1], [0], [0], [0, 0, 1, 0], [], []>} : vector<1x16xf32>, vector<16x16xf32>, vector<1x16xf32> -> vector<1x16xf32>
    %c0_15 = arith.constant 0 : index
    %c0_16 = arith.constant 0 : index
    %17 = vector.load %arg7[%c0_15, %c0_16] : memref<1x1xf32, #tpu.memory_space<vmem>>, vector<1x1xf32>
    %18 = vector.broadcast %17 : vector<1x1xf32> to vector<1x16xf32>
    %19 = arith.addf %16, %18 : vector<1x16xf32>
    %20 = arith.negf %19 : vector<1x16xf32>
    %21 = math.exp %20 : vector<1x16xf32>
    %cst_17 = arith.constant 1.000000e+00 : f32
    %22 = vector.broadcast %cst_17 : f32 to vector<1x16xf32>
    %23 = arith.addf %22, %21 : vector<1x16xf32>
    %24 = arith.divf %22, %23 : vector<1x16xf32>
    %cst_18 = arith.constant 7.400000e+01 : f32
    %25 = vector.broadcast %cst_18 : f32 to vector<1x16xf32>
    %26 = arith.mulf %24, %25 : vector<1x16xf32>
    %cst_19 = arith.constant 1.000000e+00 : f32
    %27 = vector.broadcast %cst_19 : f32 to vector<1x16xf32>
    %28 = arith.addf %27, %26 : vector<1x16xf32>
    %c0_20 = arith.constant 0 : index
    %c0_21 = arith.constant 0 : index
    %c0_22 = arith.constant 0 : index
    %29 = vector.load %arg8[%c0_20, %c0_21, %c0_22] : memref<1x1x16xf32, #tpu.memory_space<vmem>>, vector<1x1x16xf32>
    %30 = vector.shape_cast %29 : vector<1x1x16xf32> to vector<1x16xf32>
    %31 = vector.shape_cast %28 : vector<1x16xf32> to vector<1x1x16xf32>
    tpu.vector_store %arg8[%c0_20, %c0_21, %c0_22], %31 {strides = array<i32>} : memref<1x1x16xf32, #tpu.memory_space<vmem>>, vector<1x1x16xf32>,
    return
  }
  func.func @transform_0(%arg0: i32) -> (i32, i32) {
    %c0_i32 = arith.constant 0 : i32
    %c0_i32_0 = arith.constant 0 : i32
    return %arg0, %c0_i32 : i32, i32
  }
  func.func @transform_1(%arg0: i32) -> (i32, i32) {
    %c0_i32 = arith.constant 0 : i32
    %c0_i32_0 = arith.constant 0 : i32
    %c0_i32_1 = arith.constant 0 : i32
    return %c0_i32, %c0_i32_0 : i32, i32
  }
  func.func @transform_2(%arg0: i32) -> (i32, i32) {
    %c0_i32 = arith.constant 0 : i32
    %c0_i32_0 = arith.constant 0 : i32
    %c0_i32_1 = arith.constant 0 : i32
    return %c0_i32, %c0_i32_0 : i32, i32
  }
  func.func @transform_3(%arg0: i32) -> (i32, i32) {
    %c0_i32 = arith.constant 0 : i32
    %c0_i32_0 = arith.constant 0 : i32
    %c0_i32_1 = arith.constant 0 : i32
    return %c0_i32, %c0_i32_0 : i32, i32
  }
  func.func @transform_4(%arg0: i32) -> (i32, i32) {
    %c0_i32 = arith.constant 0 : i32
    %c0_i32_0 = arith.constant 0 : i32
    %c0_i32_1 = arith.constant 0 : i32
    return %c0_i32, %c0_i32_0 : i32, i32
  }
  func.func @transform_5(%arg0: i32) -> (i32, i32) {
    %c0_i32 = arith.constant 0 : i32
    %c0_i32_0 = arith.constant 0 : i32
    %c0_i32_1 = arith.constant 0 : i32
    return %c0_i32, %c0_i32_0 : i32, i32
  }
  func.func @transform_6(%arg0: i32) -> (i32, i32) {
    %c0_i32 = arith.constant 0 : i32
    %c0_i32_0 = arith.constant 0 : i32
    %c0_i32_1 = arith.constant 0 : i32
    return %c0_i32, %c0_i32_0 : i32, i32
  }
  func.func @transform_7(%arg0: i32) -> (i32, i32, i32) {
    %c0_i32 = arith.constant 0 : i32
    %c0_i32_0 = arith.constant 0 : i32
    %c0_i32_1 = arith.constant 0 : i32
    return %arg0, %c0_i32, %c0_i32_0 : i32, i32, i32
  }
}

</mosaic_0001>

<bundles_post_ra>
// kernel: tpu_custom_call.1
= control target key start
LH: loop header
LB: loop body
LE: loop exit
PB: predicated region body
PF: predicated region fallthrough
CT: control target
= control target key end

     0   :  { %s546_s0 = inlined_call_operand.vmem [shape: f32[16,32], index: 0, kind: input, shape index: {}]   ;;  %s547_s1 = inlined_call_operand.vmem [shape: f32[32,32], index: 1, kind: input, shape index: {}]   ;;  %s548_s2 = inlined_call_operand.vmem [shape: f32[1,32], index: 2, kind: input, shape index: {}]   ;;  %s549_s3 = inlined_call_operand.vmem [shape: f32[32,16], index: 3, kind: input, shape index: {}]   ;;  %s550_s4 = inlined_call_operand.vmem [shape: f32[1,16], index: 4, kind: input, shape index: {}]   ;;  %s551_s5 = inlined_call_operand.vmem [shape: f32[1,16], index: 5, kind: input, shape index: {}]   ;;  %s552_s6 = inlined_call_operand.<no memory space> [shape: f32[1,1], index: 6, kind: input, shape index: {}]   ;;  %s553_s7 = inlined_call_operand.hbm [shape: f32[1,1,16], index: 7, kind: output, shape index: {}]  }
   0x1   :  { %v12_v0 = vstv %s552_s6 }
   0x2   :  { %13 = vst [vmem:[#allocation2] sm:$0x1] %v12_v0 }
   0x3   :  { %v31_v1 = vld [vmem:[%s547_s1] sm:$0xff]  ;;  %v32_v2 = vld [vmem:[%s547_s1 + $0x8] sm:$0xff]  ;;  %v33_v3 = vld [vmem:[%s547_s1 + $0x10] sm:$0xff]  ;;  %vm42_vm0 = vcmask 261120  }
   0x4   :  { %v389_v4 = vpack.c.bf16 %v32_v2, %v31_v1  ;;  %v34_v5 = vld [vmem:[%s547_s1 + $0x18] sm:$0xff]  ;;  %v29_v6 = vld [vmem:[%s546_s0] sm:$0xff]  ;;  %v127_v9 = vld [vmem:[%s549_s3 + $0x8] sm:$0xff] }
   0x5   :  { %v393_v7 = vpack.c.bf16 %v34_v5, %v33_v3  ;;  %368 = vmatprep.mubr.msk.f32.mxu0 %vm42_vm0, %v29_v6  ;;  %v126_v8 = vld [vmem:[%s549_s3] sm:$0xff] }
   0x6   :  { %14 = vsyncpa [#allocation4], 0  ;;  %390 = vmatprep.subr.bf16.mxu0 %v389_v4  ;;  %v397_v10 = vpack.c.bf16 %v127_v9, %v126_v8  ;;  %v30_v11 = vld [vmem:[%s546_s0 + $0x8] sm:$0xff]  ;;  %v128_v12 = vld [vmem:[%s549_s3 + $0x10] sm:$0xff]  ;;  %v443_v22 = vmov 0.0|0.0   ;;  %vm444_vm1 = vmmov 0   ;;  %v227_v35 = vlaneseq }
   0x7   :  { %392 = vmatpush3.bf16.msra.mxu0 %v389_v4  ;;  %v129_v13 = vld [vmem:[%s549_s3 + $0x18] sm:$0xff]  ;;  %v335_v15 = vld [vmem:[%s548_s2] ss:$0 sm:$0xff]  ;;  %v445_v23 = vmov 0.0   ;;  %v446_v25 = vmov 0   ;;  %vm231_vm2 = vcmask 130048  }
   0x8   :  { %394 = vmatprep.subr.bf16.mxu0 %v393_v7  ;;  %398 = vmatprep.subr.bf16.mxu1 %v397_v10  ;;  %v401_v14 = vpack.c.bf16 %v129_v13, %v128_v12  ;;  %v338_v26 = vld [vmem:[%s550_s4] ss:$0 sm:$0xff]  ;;  %vm407_vm3 = vmpackc.low %vm231_vm2, %vm231_vm2  ;;  %v228_v36 = vshrl.u32 %v227_v35, 7  ;;  %s447_s4 = smov [#allocation3]   ;;  %vm319_vm4 = vcmask 122880  }
   0x9   :  { %400 = vmatpush3.bf16.msra.mxu1 %v397_v10  ;;  %v221_v24 = vld [vmem:[#allocation2] sm:$0x1]  ;;  %414 = vset.pattern.permute.xlu0 %v446_v25  ;;  %s327_s24 = sshll.u32 %s447_s4, 4  ;;  %s328_s24 = int_to_ptr.vmem [resolvable:$true] %s327_s24 }
   0xa   :  { %402 = vmatprep.subr.bf16.mxu1 %v401_v14  ;;  %224 = vperm.xlu0 %414, %v221_v24   ;;  %v220_v34 = vld [vmem:[%s551_s5] sm:$0x1]  ;;  %v229_v37 = vsub.s32 0, %v228_v36  ;;  %s419_s5 = scalar_lea.vmem %s328_s24, 16  ;;  %s423_s25 = scalar_lea.vmem %s328_s24, 32 }
   0xb   :  { %396 = vmatpush3.bf16.msra.mxu0 %v393_v7  ;;  %p420_p0 = scmp.ne.s32.totalorder %s328_s24, %s419_s5  ;;  %p424_p1 = scmp.lt.s32.totalorder %s328_s24, %s328_s24 }
   0xc   :  { %405 = vmatprep.subr.bf16.mxu0 %v443_v22  ;;  %p425_p2 = scmp.lt.s32.totalorder %s423_s25, %s419_s5 }
   0xd   :  { %404 = vmatpush3.bf16.msra.mxu1 %v401_v14 }
   0xe   :  { %369 = vmatmul.mubr.msk.f32.vlgmr.msra.gmra.mrb[0].mxu0 %vm42_vm0, %v30_v11  ;;  %p426_p3 = por %p425_p2, %p424_p1 }
   0xf   :  { %386 = vmatprep.mubr.msk.f32.mxu0 %vm444_vm1, %v445_v23 }
  0x10   :  { %p427_p4 = pnand %p426_p3, %p420_p0 }
  0x89   :  { %v225_v38 = vpop.permute.xlu0 %224 }
  0x8a   :  { %v230_v39 = vrot.slane %v225_v38, %v229_v37 }
  0xe1   :  { %v370_v16 = vpop.f32.mrb[0].mxu0 }
  0xe2   :  { %v121_v17 = vadd.f32 %v370_v16, %v335_v15  ;;  %v115_v18 = vpop.f32.mrb[1].mxu0 }
  0xe3   :  { %v116_v19 = vadd.f32 %v335_v15, %v115_v18 }
  0xe4   :  { %v125_v21 = vmax.f32 %v121_v17, 0.0 }
  0xe5   :  { %v124_v20 = vmax.f32 %v116_v19, 0.0 }
  0xe7   :  { %379 = vmatprep.mubr.msk.f32.mxu1 %vm42_vm0, %v124_v20 }
  0xe8   :  { %380 = vmatmul.mubr.msk.f32.vlgmr.msra.gmra.mrb[0].mxu1 %vm42_vm0, %v125_v21 }
 0x1bb   :  { %v381_v27 = vpop.f32.mrb[0].mxu1 }
 0x1bc   :  { %v215_v28 = vadd.f32 %v381_v27, %v338_v26  ;;  %v209_v29 = vpop.f32.mrb[1].mxu1 }
 0x1bd   :  { %v210_v30 = vadd.f32 %v338_v26, %v209_v29 }
 0x1be   :  { %v219_v31 = vmax.f32 %v215_v28, 0.0 }
 0x1bf   :  { %v218_v32 = vmax.f32 %v210_v30, 0.0 }
 0x1c1   :  { %v406_v33 = vpack.c.bf16 %v219_v31, %v218_v32 }
 0x1c3   :  { %408 = vmatpush3.bf16.xpose.msk.msra.mxu0 %vm407_vm3, %v406_v33 }
 0x1ca   :  { %387 = vmatmul.mubr.msk.f32.vlgmr.msra.gmra.mrb[2].mxu0 %vm231_vm2, %v220_v34 }
 0x29d   :  { %v307_v40 = vpop.f32.mrb[2].mxu0 }
 0x29e   :  { %v308_v41 = vadd.f32 %v307_v40, %v230_v39  ;;  %v388_v42 = vpop.f32.mrb[3].mxu0 }
 0x2a0   :  { %v344_v43 = vmul.f32 -1.442695, %v308_v41 }
 0x2a2   :  { %415 = vpow2.f32 %v344_v43 }
 0x2ac   :  { %v416_v44 = vpop.eup %415 }
 0x2ad   :  { %v314_v45 = vadd.f32 1.0, %v416_v44 }
 0x2af   :  { %417 = vrcp.f32 %v314_v45 }
 0x2b9   :  { %v418_v46 = vpop.eup %417 }
 0x2ba   :  { %v317_v47 = vmul.f32 74.0, %v418_v46 }
 0x2bc   :  { %v318_v48 = vadd.f32 1.0, %v317_v47 }
 0x2be   :  { %320 = vst.msk [vmem:[#allocation3] sm:$0x1] %vm319_vm4, %v318_v48 }
 0x2bf   :  { %430 = shalt.err (!%p427_p4)
}
 0x2c0   :  { %s431_s28 = scalar_lea.hbm %s553_s7, 16 }
 0x2c1   :  { %p432_p5 = scmp.ne.s32.totalorder %s553_s7, %s431_s28  ;;  %p435_p6 = scmp.lt.u32.totalorder %s431_s28, %s553_s7 }
 0x2c3   :  { %p437_p7 = pnand %p435_p6, %p432_p5 }
 0x2c5   :  { %440 = shalt.err (!%p437_p7)
}
 0x2c6   :  { %330 = dma.vmem_to_hbm [thread:$0]  %s328_s24, 16, %s553_s7, [#allocation4]  }
 0x2c7   :  { %441 = dma.done.wait [#allocation4], 16  }
 0x2c8   :  { %442 = vsyncadd [#allocation4], 4294967280 }
 0x2c9   :  { %334 = vsyncpa [#allocation4], 1 }

</bundles_post_ra>
